<compile_context>
chip_gen: v7x
topology: tpu7x:2x2x1
jax: 0.10.0
libtpu: 0.0.40
codegen_flags: <defaults>
</compile_context>

<pallas_src>
import functools

import jax
import jax.numpy as jnp
from jax.experimental import pallas as pl
from jax.experimental.pallas import tpu as pltpu


# ------------------------------ fused kernel ---------------------------------

def _dpb_kernel(x_ref, w_ref, v_ref, o_ref, *, pd, nh, residual):
    """Fused DynamicPosBias forward on one lane-tile, feature-major layout.

    x_ref : (2, TM)       relative-position coordinates (feature-major)
    w_ref : (3*pd, pd)    [W1^T ; W2^T ; W3^T (rows nh:pd zero-padded)]
    v_ref : (pd, 12)      columns: wp0, wp1, bp, (ln_g, ln_b, lin_b) x 3
                          (pos3 linear bias zero-padded from nh to pd)
    o_ref : (nh, TM)
    """
    x = x_ref[...]                                       # (2, TM)
    v = v_ref[...]                                       # (pd, 12)

    # pos_proj: contraction width is only 2 -> two VPU broadcast mul-adds.
    pos = v[:, 0:1] * x[0:1, :] + v[:, 1:2] * x[1:2, :] + v[:, 2:3]   # (pd, TM)

    def ln_relu_lin(p, c, wt):
        # LayerNorm (eps=1e-5) over the feature (sublane) axis -> ReLU -> Linear.
        mu = jnp.mean(p, axis=0, keepdims=True)
        var = jnp.mean((p - mu) ** 2, axis=0, keepdims=True)
        y = (p - mu) * jax.lax.rsqrt(var + 1e-5)
        y = jnp.maximum(y * v[:, c:c + 1] + v[:, c + 1:c + 2], 0.0)
        # (pd,pd) x (pd,TM) on the MXU; vector-extended slot is otherwise idle.
        return (jnp.dot(wt, y, preferred_element_type=jnp.float32)
                + v[:, c + 2:c + 3])

    w1 = w_ref[0:pd, :]
    w2 = w_ref[pd:2 * pd, :]
    w3 = w_ref[2 * pd:3 * pd, :]      # rows nh:pd are zero

    if residual:
        pos = pos + ln_relu_lin(pos, 3, w1)
        pos = pos + ln_relu_lin(pos, 6, w2)
        pos = ln_relu_lin(pos, 9, w3)
    else:
        pos = ln_relu_lin(ln_relu_lin(ln_relu_lin(pos, 3, w1), 6, w2), 9, w3)

    o_ref[...] = pos[:nh, :].astype(o_ref.dtype)


# ------------------------------ wrappers --------------------------------------

def pack_params(p):
    """Pack the 11 tiny parameter tensors into 2 slabs (do once at prep time)."""
    pd = p["pos_proj_w"].shape[1]
    nh = p["pos3_w"].shape[1]
    f32 = jnp.float32

    w3t = jnp.zeros((pd, pd), f32).at[:nh, :].set(p["pos3_w"].T.astype(f32))
    w_slab = jnp.concatenate(
        [p["pos1_w"].T.astype(f32), p["pos2_w"].T.astype(f32), w3t], axis=0)  # (3pd, pd)

    b3 = jnp.zeros((pd,), f32).at[:nh].set(p["pos3_b"].astype(f32))
    cols = [p["pos_proj_w"][0], p["pos_proj_w"][1], p["pos_proj_b"],
            p["pos1_ln_g"], p["pos1_ln_b"], p["pos1_b"],
            p["pos2_ln_g"], p["pos2_ln_b"], p["pos2_b"],
            p["pos3_ln_g"], p["pos3_ln_b"], b3]
    v_slab = jnp.stack([c.astype(f32) for c in cols], axis=1)                  # (pd, 12)
    return w_slab, v_slab, pd, nh


def dynamic_pos_bias_packed(x_t, w_slab, v_slab, *, nh, residual, tile_m=512):
    """Core fused call. x_t: (2, M) feature-major coords -> (nh, M) heads-major."""
    two, M = x_t.shape
    assert two == 2
    pd = v_slab.shape[0]

    # One fat tile when M is small; otherwise 512-wide lane tiles.  On v7x with
    # large M the "parallel" row axis shards the grid across both TensorCores.
    tm = min(tile_m, ((M + 127) // 128) * 128)
    tm = ((tm + 127) // 128) * 128
    n_tiles = pl.cdiv(M, tm)

    return pl.pallas_call(
        functools.partial(_dpb_kernel, pd=pd, nh=nh, residual=residual),
        out_shape=jax.ShapeDtypeStruct((nh, M), jnp.float32),
        grid=(n_tiles,),
        in_specs=[
            pl.BlockSpec((2, tm), lambda i: (0, i)),          # streamed coord tile
            pl.BlockSpec((3 * pd, pd), lambda i: (0, 0)),     # resident weight slab
            pl.BlockSpec((pd, 12), lambda i: (0, 0)),         # resident vector slab
        ],
        out_specs=pl.BlockSpec((nh, tm), lambda i: (0, i)),   # lane-dense stores
        compiler_params=pltpu.CompilerParams(
            dimension_semantics=("parallel",)),
    )(x_t, w_slab, v_slab)


def dynamic_pos_bias(biases, p, *, residual, tile_m=512, heads_major=False):
    """DynamicPosBias forward. biases: (M, 2) -> (M, num_heads).

    Set heads_major=True to get the (num_heads, M) kernel output directly
    (the orientation the downstream attention-bias permute usually wants),
    skipping the tiny final transpose.
    """
    w_slab, v_slab, _, nh = pack_params(p)
    out = dynamic_pos_bias_packed(biases.astype(jnp.float32).T, w_slab, v_slab,
                                  nh=nh, residual=residual, tile_m=tile_m)
    return out if heads_major else out.T


# ------------------------------ parameters ------------------------------------

def init_params(key, dim, num_heads):
    pos_dim = dim // 4
    keys = iter(jax.random.split(key, 16))

    def w(shape, s=0.1):
        return jax.random.normal(next(keys), shape, jnp.float32) * s

    p = {}
    p["pos_proj_w"], p["pos_proj_b"] = w((2, pos_dim)), w((pos_dim,))
    for i in (1, 2):
        p[f"pos{i}_ln_g"] = 1.0 + w((pos_dim,))
        p[f"pos{i}_ln_b"] = w((pos_dim,))
        p[f"pos{i}_w"], p[f"pos{i}_b"] = w((pos_dim, pos_dim)), w((pos_dim,))
    p["pos3_ln_g"] = 1.0 + w((pos_dim,))
    p["pos3_ln_b"] = w((pos_dim,))
    p["pos3_w"], p["pos3_b"] = w((pos_dim, num_heads)), w((num_heads,))
    return p


def rpe_biases(H, W):
    """The relative-position coordinate grid usually fed to DynamicPosBias."""
    ph = jnp.arange(1 - H, H, dtype=jnp.float32)
    pw = jnp.arange(1 - W, W, dtype=jnp.float32)
    bh, bw = jnp.meshgrid(ph, pw, indexing="ij")
    return jnp.stack([bh.reshape(-1), bw.reshape(-1)], axis=-1)   # ((2H-1)(2W-1), 2)


# ------------------------------ pure-JAX reference -----------------------------

def reference_dpb(biases, p, residual):
    def ln(t, g, b):
        mu = jnp.mean(t, -1, keepdims=True)
        var = jnp.mean((t - mu) ** 2, -1, keepdims=True)
        return (t - mu) / jnp.sqrt(var + 1e-5) * g + b

    def blk(t, g, b, w, bl):
        return jnp.maximum(ln(t, g, b), 0.0) @ w + bl

    pos = biases @ p["pos_proj_w"] + p["pos_proj_b"]
    if residual:
        pos = pos + blk(pos, p["pos1_ln_g"], p["pos1_ln_b"], p["pos1_w"], p["pos1_b"])
        pos = pos + blk(pos, p["pos2_ln_g"], p["pos2_ln_b"], p["pos2_w"], p["pos2_b"])
        pos = blk(pos, p["pos3_ln_g"], p["pos3_ln_b"], p["pos3_w"], p["pos3_b"])
    else:
        pos = blk(pos, p["pos1_ln_g"], p["pos1_ln_b"], p["pos1_w"], p["pos1_b"])
        pos = blk(pos, p["pos2_ln_g"], p["pos2_ln_b"], p["pos2_w"], p["pos2_b"])
        pos = blk(pos, p["pos3_ln_g"], p["pos3_ln_b"], p["pos3_w"], p["pos3_b"])
    return pos


# ------------------------------ main -------------------------------------------

if __name__ == "__main__":
    dim, num_heads, H, W = 32, 4, 8, 8           # pos_dim = 8, M = (2H-1)(2W-1) = 225
    key = jax.random.PRNGKey(0)
    params = init_params(key, dim, num_heads)
    biases = rpe_biases(H, W)                    # (225, 2), deterministic

    ok = True
    for residual in (False, True):
        out = dynamic_pos_bias(biases, params, residual=residual)
        out = jax.block_until_ready(out)
        ref = reference_dpb(biases, params, residual)
        assert out.shape == (biases.shape[0], num_heads)
        max_err = float(jnp.max(jnp.abs(out - ref)))
        if not bool(jnp.allclose(out, ref, atol=1e-4, rtol=1e-4)):
            ok = False
            print(f"mismatch (residual={residual}): {max_err}")

        # Heads-major path (zero-copy kernel output) must match too.
        out_hm = jax.block_until_ready(
            dynamic_pos_bias(biases, params, residual=residual, heads_major=True))
        if not bool(jnp.allclose(out_hm, ref.T, atol=1e-4, rtol=1e-4)):
            ok = False
            print(f"mismatch heads_major (residual={residual})")
    assert ok
    print("KERNEL_OK")
</pallas_src>

<mosaic_0001>
module attributes {stable_mosaic.version = 11 : i64} {
  func.func @_dpb_kernel(%arg0: i32, %arg1: memref<2x256xf32, #tpu.memory_space<vmem>>, %arg2: memref<24x8xf32, #tpu.memory_space<vmem>>, %arg3: memref<8x12xf32, #tpu.memory_space<vmem>>, %arg4: memref<4x256xf32, #tpu.memory_space<vmem>>) attributes {dimension_semantics = [#tpu.dimension_semantics<parallel>], iteration_bounds = array<i64: 1>, scalar_prefetch = 0 : i64, scratch_operands = 0 : i64, tpu.core_type = #tpu.core_type<tc>, window_params = [{transform_indices = @transform_0, window_bounds = array<i64: 2, 256>}, {pipeline_mode = #tpu.pipeline_mode<synchronous>, transform_indices = @transform_1, window_bounds = array<i64: 24, 8>}, {pipeline_mode = #tpu.pipeline_mode<synchronous>, transform_indices = @transform_2, window_bounds = array<i64: 8, 12>}, {transform_indices = @transform_3, window_bounds = array<i64: 4, 256>}]} {
    %c0 = arith.constant 0 : index
    %c0_0 = arith.constant 0 : index
    %0 = vector.load %arg1[%c0, %c0_0] : memref<2x256xf32, #tpu.memory_space<vmem>>, vector<2x256xf32>
    %c0_1 = arith.constant 0 : index
    %c0_2 = arith.constant 0 : index
    %1 = vector.load %arg3[%c0_1, %c0_2] : memref<8x12xf32, #tpu.memory_space<vmem>>, vector<8x12xf32>
    %2 = vector.extract_strided_slice %1 {offsets = [0, 0], sizes = [8, 1], strides = [1, 1]} : vector<8x12xf32> to vector<8x1xf32>
    %3 = vector.extract_strided_slice %0 {offsets = [0, 0], sizes = [1, 256], strides = [1, 1]} : vector<2x256xf32> to vector<1x256xf32>
    %4 = vector.broadcast %2 : vector<8x1xf32> to vector<8x256xf32>
    %5 = vector.broadcast %3 : vector<1x256xf32> to vector<8x256xf32>
    %6 = arith.mulf %4, %5 : vector<8x256xf32>
    %7 = vector.extract_strided_slice %1 {offsets = [0, 1], sizes = [8, 1], strides = [1, 1]} : vector<8x12xf32> to vector<8x1xf32>
    %8 = vector.extract_strided_slice %0 {offsets = [1, 0], sizes = [1, 256], strides = [1, 1]} : vector<2x256xf32> to vector<1x256xf32>
    %9 = vector.broadcast %7 : vector<8x1xf32> to vector<8x256xf32>
    %10 = vector.broadcast %8 : vector<1x256xf32> to vector<8x256xf32>
    %11 = arith.mulf %9, %10 : vector<8x256xf32>
    %12 = arith.addf %6, %11 : vector<8x256xf32>
    %13 = vector.extract_strided_slice %1 {offsets = [0, 2], sizes = [8, 1], strides = [1, 1]} : vector<8x12xf32> to vector<8x1xf32>
    %14 = vector.broadcast %13 : vector<8x1xf32> to vector<8x256xf32>
    %15 = arith.addf %12, %14 : vector<8x256xf32>
    %c0_3 = arith.constant 0 : index
    %c0_4 = arith.constant 0 : index
    %16 = vector.load %arg2[%c0_3, %c0_4] : memref<24x8xf32, #tpu.memory_space<vmem>>, vector<8x8xf32>
    %c8 = arith.constant 8 : index
    %c0_5 = arith.constant 0 : index
    %17 = vector.load %arg2[%c8, %c0_5] : memref<24x8xf32, #tpu.memory_space<vmem>>, vector<8x8xf32>
    %c16 = arith.constant 16 : index
    %c0_6 = arith.constant 0 : index
    %18 = vector.load %arg2[%c16, %c0_6] : memref<24x8xf32, #tpu.memory_space<vmem>>, vector<8x8xf32>
    %cst = arith.constant dense<0.000000e+00> : vector<256xf32>
    %19 = vector.multi_reduction <add>, %15, %cst [0] : vector<8x256xf32> to vector<256xf32>
    %20 = vector.shape_cast %19 : vector<256xf32> to vector<1x256xf32>
    %cst_7 = arith.constant 8.000000e+00 : f32
    %21 = vector.broadcast %cst_7 : f32 to vector<1x256xf32>
    %22 = arith.divf %20, %21 : vector<1x256xf32>
    %23 = vector.broadcast %22 : vector<1x256xf32> to vector<8x256xf32>
    %24 = arith.subf %15, %23 : vector<8x256xf32>
    %25 = arith.mulf %24, %24 : vector<8x256xf32>
    %cst_8 = arith.constant dense<0.000000e+00> : vector<256xf32>
    %26 = vector.multi_reduction <add>, %25, %cst_8 [0] : vector<8x256xf32> to vector<256xf32>
    %27 = vector.shape_cast %26 : vector<256xf32> to vector<1x256xf32>
    %cst_9 = arith.constant 8.000000e+00 : f32
    %28 = vector.broadcast %cst_9 : f32 to vector<1x256xf32>
    %29 = arith.divf %27, %28 : vector<1x256xf32>
    %30 = vector.broadcast %22 : vector<1x256xf32> to vector<8x256xf32>
    %31 = arith.subf %15, %30 : vector<8x256xf32>
    %cst_10 = arith.constant 9.99999974E-6 : f32
    %32 = vector.broadcast %cst_10 : f32 to vector<1x256xf32>
    %33 = arith.addf %29, %32 : vector<1x256xf32>
    %34 = math.rsqrt %33 : vector<1x256xf32>
    %35 = vector.broadcast %34 : vector<1x256xf32> to vector<8x256xf32>
    %36 = arith.mulf %31, %35 : vector<8x256xf32>
    %37 = vector.extract_strided_slice %1 {offsets = [0, 3], sizes = [8, 1], strides = [1, 1]} : vector<8x12xf32> to vector<8x1xf32>
    %38 = vector.broadcast %37 : vector<8x1xf32> to vector<8x256xf32>
    %39 = arith.mulf %36, %38 : vector<8x256xf32>
    %40 = vector.extract_strided_slice %1 {offsets = [0, 4], sizes = [8, 1], strides = [1, 1]} : vector<8x12xf32> to vector<8x1xf32>
    %41 = vector.broadcast %40 : vector<8x1xf32> to vector<8x256xf32>
    %42 = arith.addf %39, %41 : vector<8x256xf32>
    %cst_11 = arith.constant 0.000000e+00 : f32
    %43 = vector.broadcast %cst_11 : f32 to vector<8x256xf32>
    %44 = arith.maximumf %42, %43 : vector<8x256xf32>
    %cst_12 = arith.constant dense<0.000000e+00> : vector<8x256xf32>
    %45 = tpu.matmul %16, %44, %cst_12 {dimension_numbers = #tpu.dot_dimension_numbers<[1], [0], [0], [1], [0, 0, 1, 1], [], []>} : vector<8x8xf32>, vector<8x256xf32>, vector<8x256xf32> -> vector<8x256xf32>
    %46 = vector.extract_strided_slice %1 {offsets = [0, 5], sizes = [8, 1], strides = [1, 1]} : vector<8x12xf32> to vector<8x1xf32>
    %47 = vector.broadcast %46 : vector<8x1xf32> to vector<8x256xf32>
    %48 = arith.addf %45, %47 : vector<8x256xf32>
    %cst_13 = arith.constant dense<0.000000e+00> : vector<256xf32>
    %49 = vector.multi_reduction <add>, %48, %cst_13 [0] : vector<8x256xf32> to vector<256xf32>
    %50 = vector.shape_cast %49 : vector<256xf32> to vector<1x256xf32>
    %cst_14 = arith.constant 8.000000e+00 : f32
    %51 = vector.broadcast %cst_14 : f32 to vector<1x256xf32>
    %52 = arith.divf %50, %51 : vector<1x256xf32>
    %53 = vector.broadcast %52 : vector<1x256xf32> to vector<8x256xf32>
    %54 = arith.subf %48, %53 : vector<8x256xf32>
    %55 = arith.mulf %54, %54 : vector<8x256xf32>
    %cst_15 = arith.constant dense<0.000000e+00> : vector<256xf32>
    %56 = vector.multi_reduction <add>, %55, %cst_15 [0] : vector<8x256xf32> to vector<256xf32>
    %57 = vector.shape_cast %56 : vector<256xf32> to vector<1x256xf32>
    %cst_16 = arith.constant 8.000000e+00 : f32
    %58 = vector.broadcast %cst_16 : f32 to vector<1x256xf32>
    %59 = arith.divf %57, %58 : vector<1x256xf32>
    %60 = vector.broadcast %52 : vector<1x256xf32> to vector<8x256xf32>
    %61 = arith.subf %48, %60 : vector<8x256xf32>
    %cst_17 = arith.constant 9.99999974E-6 : f32
    %62 = vector.broadcast %cst_17 : f32 to vector<1x256xf32>
    %63 = arith.addf %59, %62 : vector<1x256xf32>
    %64 = math.rsqrt %63 : vector<1x256xf32>
    %65 = vector.broadcast %64 : vector<1x256xf32> to vector<8x256xf32>
    %66 = arith.mulf %61, %65 : vector<8x256xf32>
    %67 = vector.extract_strided_slice %1 {offsets = [0, 6], sizes = [8, 1], strides = [1, 1]} : vector<8x12xf32> to vector<8x1xf32>
    %68 = vector.broadcast %67 : vector<8x1xf32> to vector<8x256xf32>
    %69 = arith.mulf %66, %68 : vector<8x256xf32>
    %70 = vector.extract_strided_slice %1 {offsets = [0, 7], sizes = [8, 1], strides = [1, 1]} : vector<8x12xf32> to vector<8x1xf32>
    %71 = vector.broadcast %70 : vector<8x1xf32> to vector<8x256xf32>
    %72 = arith.addf %69, %71 : vector<8x256xf32>
    %cst_18 = arith.constant 0.000000e+00 : f32
    %73 = vector.broadcast %cst_18 : f32 to vector<8x256xf32>
    %74 = arith.maximumf %72, %73 : vector<8x256xf32>
    %cst_19 = arith.constant dense<0.000000e+00> : vector<8x256xf32>
    %75 = tpu.matmul %17, %74, %cst_19 {dimension_numbers = #tpu.dot_dimension_numbers<[1], [0], [0], [1], [0, 0, 1, 1], [], []>} : vector<8x8xf32>, vector<8x256xf32>, vector<8x256xf32> -> vector<8x256xf32>
    %76 = vector.extract_strided_slice %1 {offsets = [0, 8], sizes = [8, 1], strides = [1, 1]} : vector<8x12xf32> to vector<8x1xf32>
    %77 = vector.broadcast %76 : vector<8x1xf32> to vector<8x256xf32>
    %78 = arith.addf %75, %77 : vector<8x256xf32>
    %cst_20 = arith.constant dense<0.000000e+00> : vector<256xf32>
    %79 = vector.multi_reduction <add>, %78, %cst_20 [0] : vector<8x256xf32> to vector<256xf32>
    %80 = vector.shape_cast %79 : vector<256xf32> to vector<1x256xf32>
    %cst_21 = arith.constant 8.000000e+00 : f32
    %81 = vector.broadcast %cst_21 : f32 to vector<1x256xf32>
    %82 = arith.divf %80, %81 : vector<1x256xf32>
    %83 = vector.broadcast %82 : vector<1x256xf32> to vector<8x256xf32>
    %84 = arith.subf %78, %83 : vector<8x256xf32>
    %85 = arith.mulf %84, %84 : vector<8x256xf32>
    %cst_22 = arith.constant dense<0.000000e+00> : vector<256xf32>
    %86 = vector.multi_reduction <add>, %85, %cst_22 [0] : vector<8x256xf32> to vector<256xf32>
    %87 = vector.shape_cast %86 : vector<256xf32> to vector<1x256xf32>
    %cst_23 = arith.constant 8.000000e+00 : f32
    %88 = vector.broadcast %cst_23 : f32 to vector<1x256xf32>
    %89 = arith.divf %87, %88 : vector<1x256xf32>
    %90 = vector.broadcast %82 : vector<1x256xf32> to vector<8x256xf32>
    %91 = arith.subf %78, %90 : vector<8x256xf32>
    %cst_24 = arith.constant 9.99999974E-6 : f32
    %92 = vector.broadcast %cst_24 : f32 to vector<1x256xf32>
    %93 = arith.addf %89, %92 : vector<1x256xf32>
    %94 = math.rsqrt %93 : vector<1x256xf32>
    %95 = vector.broadcast %94 : vector<1x256xf32> to vector<8x256xf32>
    %96 = arith.mulf %91, %95 : vector<8x256xf32>
    %97 = vector.extract_strided_slice %1 {offsets = [0, 9], sizes = [8, 1], strides = [1, 1]} : vector<8x12xf32> to vector<8x1xf32>
    %98 = vector.broadcast %97 : vector<8x1xf32> to vector<8x256xf32>
    %99 = arith.mulf %96, %98 : vector<8x256xf32>
    %100 = vector.extract_strided_slice %1 {offsets = [0, 10], sizes = [8, 1], strides = [1, 1]} : vector<8x12xf32> to vector<8x1xf32>
    %101 = vector.broadcast %100 : vector<8x1xf32> to vector<8x256xf32>
    %102 = arith.addf %99, %101 : vector<8x256xf32>
    %cst_25 = arith.constant 0.000000e+00 : f32
    %103 = vector.broadcast %cst_25 : f32 to vector<8x256xf32>
    %104 = arith.maximumf %102, %103 : vector<8x256xf32>
    %cst_26 = arith.constant dense<0.000000e+00> : vector<8x256xf32>
    %105 = tpu.matmul %18, %104, %cst_26 {dimension_numbers = #tpu.dot_dimension_numbers<[1], [0], [0], [1], [0, 0, 1, 1], [], []>} : vector<8x8xf32>, vector<8x256xf32>, vector<8x256xf32> -> vector<8x256xf32>
    %106 = vector.extract_strided_slice %1 {offsets = [0, 11], sizes = [8, 1], strides = [1, 1]} : vector<8x12xf32> to vector<8x1xf32>
    %107 = vector.broadcast %106 : vector<8x1xf32> to vector<8x256xf32>
    %108 = arith.addf %105, %107 : vector<8x256xf32>
    %109 = vector.extract_strided_slice %108 {offsets = [0, 0], sizes = [4, 256], strides = [1, 1]} : vector<8x256xf32> to vector<4x256xf32>
    %c0_27 = arith.constant 0 : index
    %c0_28 = arith.constant 0 : index
    %110 = vector.load %arg4[%c0_27, %c0_28] : memref<4x256xf32, #tpu.memory_space<vmem>>, vector<4x256xf32>
    tpu.vector_store %arg4[%c0_27, %c0_28], %109 {strides = array<i32>} : memref<4x256xf32, #tpu.memory_space<vmem>>, vector<4x256xf32>,
    return
  }
  func.func @transform_0(%arg0: i32) -> (i32, i32) {
    %c0_i32 = arith.constant 0 : i32
    %c0_i32_0 = arith.constant 0 : i32
    return %c0_i32, %arg0 : i32, i32
  }
  func.func @transform_1(%arg0: i32) -> (i32, i32) {
    %c0_i32 = arith.constant 0 : i32
    %c0_i32_0 = arith.constant 0 : i32
    %c0_i32_1 = arith.constant 0 : i32
    return %c0_i32, %c0_i32_0 : i32, i32
  }
  func.func @transform_2(%arg0: i32) -> (i32, i32) {
    %c0_i32 = arith.constant 0 : i32
    %c0_i32_0 = arith.constant 0 : i32
    %c0_i32_1 = arith.constant 0 : i32
    return %c0_i32, %c0_i32_0 : i32, i32
  }
  func.func @transform_3(%arg0: i32) -> (i32, i32) {
    %c0_i32 = arith.constant 0 : i32
    %c0_i32_0 = arith.constant 0 : i32
    return %c0_i32, %arg0 : i32, i32
  }
}

</mosaic_0001>

<bundles_post_ra>
// kernel: tpu_custom_call.1
= control target key start
LH: loop header
LB: loop body
LE: loop exit
PB: predicated region body
PF: predicated region fallthrough
CT: control target
= control target key end

     0   :  { %v554_v1 = vmov 0   ;;  %v555_v2 = vmov 2   ;;  %s635_s0 = inlined_call_operand.vmem [shape: f32[2,225], index: 0, kind: input, shape index: {}]   ;;  %s636_s1 = inlined_call_operand.vmem [shape: f32[24,8], index: 1, kind: input, shape index: {}]   ;;  %s637_s2 = inlined_call_operand.vmem [shape: f32[8,12], index: 2, kind: input, shape index: {}]   ;;  %s638_s3 = inlined_call_operand.hbm [shape: f32[4,225], index: 3, kind: output, shape index: {}]  }
   0x1   :  { %v591_v0 = vld [vmem:[%s637_s2] sm:$0xff]  ;;  %506 = vset.pattern.permute.xlu0 %v554_v1  ;;  %508 = vset.pattern.permute.xlu1 %v555_v2 }
   0x2   :  { %8 = vsyncpa [#allocation3], 0  ;;  %19 = vperm.xlu0 %506, %v591_v0   ;;  %70 = vperm.xlu1 %508, %v591_v0   ;;  %v556_v3 = vmov 1   ;;  %v557_v4 = vmov 3   ;;  %v558_v5 = vmov 4   ;;  %v559_v6 = vmov 0.0  }
   0x3   :  { %203 = vmatprep.mubr.f32.mxu0 %v559_v6  ;;  %333 = vmatprep.mubr.f32.mxu1 %v559_v6  ;;  %v560_v7 = vmov 5   ;;  %v561_v8 = vmov 6   ;;  %v562_v9 = vmov 7   ;;  %v23_v10 = vlaneseq  ;;  %v15_v16 = vld [vmem:[%s635_s0] sm:$0xf]  ;;  %s567_s20 = smov [#allocation2]  }
   0x4   :  { %vm135_vm0 = vcmask 64512   ;;  %s481_s21 = sshll.u32 %s567_s20, 4  ;;  %s482_s21 = int_to_ptr.vmem [resolvable:$true] %s481_s21 }
   0x5   :  { %v24_v11 = vshrl.u32 %v23_v10, 7  ;;  %s530_s22 = scalar_lea.vmem %s482_s21, 128  ;;  %p535_p1 = scmp.lt.s32.totalorder %s482_s21, %s482_s21 }
   0x6   :  { %507 = vset.pattern.permute.xlu0 %v556_v3  ;;  %509 = vset.pattern.permute.xlu1 %v557_v4  ;;  %p531_p0 = scmp.ne.s32.totalorder %s482_s21, %s530_s22  ;;  %p536_p2 = scmp.lt.s32.totalorder %s530_s22, %s530_s22 }
   0x7   :  { %44 = vperm.xlu0 %507, %v591_v0   ;;  %118 = vperm.xlu1 %509, %v591_v0   ;;  %v25_v12 = vsub.s32 0, %v24_v11  ;;  %v29_v13 = vsub.s32 2, %v24_v11  ;;  %v49_v14 = vsub.s32 1, %v24_v11  ;;  %v53_v15 = vsub.s32 3, %v24_v11 }
   0x8   :  { %p537_p3 = por %p536_p2, %p535_p1 }
   0x9   :  { %v26_v17 = vrot.slane %v15_v16, %v25_v12  ;;  %v30_v18 = vrot.slane %v15_v16, %v29_v13  ;;  %v50_v19 = vrot.slane %v15_v16, %v49_v14  ;;  %v54_v20 = vrot.slane %v15_v16, %v53_v15 }
   0xa   :  { %p538_p4 = pnand %p537_p3, %p531_p0 }
   0xb   :  { %510 = vset.pattern.permute.xlu1 %v558_v5  ;;  %511 = vset.pattern.permute.xlu0 %v560_v7  ;;  %v36_v22 = vrot.slane %v26_v17, %v25_v12  ;;  %v40_v23 = vrot.slane %v30_v18, %v25_v12  ;;  %v60_v24 = vrot.slane %v50_v19, %v49_v14 }
   0xc   :  { %124 = vperm.xlu1 %510, %v591_v0   ;;  %132 = vperm.xlu0 %511, %v591_v0   ;;  %v64_v25 = vrot.slane %v54_v20, %v49_v14  ;;  %v75_v20 = vld [vmem:[%s636_s1] sm:$0xff] }
  0x10   :  { %512 = vset.pattern.permute.xlu1 %v561_v8 }
  0x11   :  { %249 = vperm.xlu1 %512, %v591_v0  }
  0x15   :  { %513 = vset.pattern.permute.xlu1 %v562_v9 }
  0x16   :  { %255 = vperm.xlu1 %513, %v591_v0  }
  0x81   :  { %v20_v21 = vpop.permute.xlu0 %19  ;;  %v71_v31 = vpop.permute.xlu1 %70 }
  0x82   :  { %v41_v27 = vmul.f32 %v36_v22, %v20_v21  ;;  %v42_v28 = vmul.f32 %v40_v23, %v20_v21  ;;  %v563_v21 = vmov 8   ;;  %v564_v22 = vmov 9  }
  0x83   :  { %514 = vset.pattern.permute.xlu0 %v563_v21  ;;  %515 = vset.pattern.permute.xlu1 %v564_v22  ;;  %v565_v23 = vmov 10  }
  0x84   :  { %263 = vperm.xlu0 %514, %v591_v0   ;;  %379 = vperm.xlu1 %515, %v591_v0  }
  0x86   :  { %v45_v26 = vpop.permute.xlu0 %44  ;;  %v119_v8 = vpop.permute.xlu1 %118 }
  0x87   :  { %v65_v29 = vmul.f32 %v60_v24, %v45_v26  ;;  %v66_v30 = vmul.f32 %v64_v25, %v45_v26 }
  0x88   :  { %516 = vset.pattern.permute.xlu1 %v565_v23 }
  0x89   :  { %v67_v32 = vadd.f32 %v65_v29, %v41_v27  ;;  %v68_v33 = vadd.f32 %v66_v30, %v42_v28  ;;  %385 = vperm.xlu1 %516, %v591_v0  }
  0x8b   :  { %v73_v34 = vadd.f32 %v71_v31, %v67_v32  ;;  %v74_v35 = vadd.f32 %v71_v31, %v68_v33  ;;  %v125_v13 = vpop.permute.xlu1 %124  ;;  %v133_v24 = vpop.permute.xlu0 %132 }
  0x8d   :  { %v78_v36 = vrot.slane %v73_v34, 4  ;;  %v84_v37 = vrot.slane %v74_v35, 4 }
  0x8f   :  { %v79_v38 = vadd.f32 %v78_v36, %v73_v34  ;;  %v85_v39 = vadd.f32 %v84_v37, %v74_v35 }
  0x91   :  { %v80_v40 = vrot.slane %v79_v38, 2  ;;  %v86_v41 = vrot.slane %v85_v39, 2 }
  0x93   :  { %v81_v42 = vadd.f32 %v80_v40, %v79_v38  ;;  %v87_v43 = vadd.f32 %v86_v41, %v85_v39 }
  0x95   :  { %v82_v44 = vrot.slane %v81_v42, 1  ;;  %v88_v45 = vrot.slane %v87_v43, 1 }
  0x97   :  { %v83_v46 = vadd.f32 %v82_v44, %v81_v42  ;;  %v89_v47 = vadd.f32 %v88_v45, %v87_v43 }
  0x99   :  { %v91_v48 = vmul.f32 0.125, %v83_v46  ;;  %v92_v49 = vmul.f32 0.125, %v89_v47 }
  0x9b   :  { %v93_v50 = vsub.f32 %v73_v34, %v91_v48  ;;  %v94_v51 = vsub.f32 %v74_v35, %v92_v49 }
  0x9d   :  { %v95_v52 = vmul.f32 %v93_v50, %v93_v50  ;;  %v96_v53 = vmul.f32 %v94_v51, %v94_v51 }
  0x9f   :  { %v97_v54 = vrot.slane %v95_v52, 4  ;;  %v103_v55 = vrot.slane %v96_v53, 4 }
  0xa1   :  { %v98_v56 = vadd.f32 %v97_v54, %v95_v52  ;;  %v104_v57 = vadd.f32 %v103_v55, %v96_v53 }
  0xa3   :  { %v99_v58 = vrot.slane %v98_v56, 2  ;;  %v105_v59 = vrot.slane %v104_v57, 2 }
  0xa5   :  { %v100_v60 = vadd.f32 %v99_v58, %v98_v56  ;;  %v106_v61 = vadd.f32 %v105_v59, %v104_v57 }
  0xa7   :  { %v101_v62 = vrot.slane %v100_v60, 1  ;;  %v107_v63 = vrot.slane %v106_v61, 1 }
  0xa9   :  { %v102_v1 = vadd.f32 %v101_v62, %v100_v60  ;;  %v108_v2 = vadd.f32 %v107_v63, %v106_v61  ;;  %v250_v62 = vpop.permute.xlu1 %249 }
  0xab   :  { %v109_v3 = vmul.f32 0.125, %v102_v1  ;;  %v110_v4 = vmul.f32 0.125, %v108_v2 }
  0xad   :  { %v111_v5 = vadd.f32 1e-05, %v109_v3  ;;  %v112_v7 = vadd.f32 1e-05, %v110_v4  ;;  %v256_v4 = vpop.permute.xlu1 %255 }
  0xaf   :  { %518 = vrsqrt.f32 %v111_v5 }
  0xb0   :  { %520 = vrsqrt.f32 %v112_v7 }
  0xb9   :  { %v519_v9 = vpop.eup %518 }
  0xba   :  { %v521_v10 = vpop.eup %520  ;;  %v115_v11 = vmul.f32 %v519_v9, %v93_v50 }
  0xbb   :  { %v116_v12 = vmul.f32 %v521_v10, %v94_v51 }
  0xbc   :  { %v121_v14 = vmul.f32 %v119_v8, %v115_v11 }
  0xbd   :  { %v122_v15 = vmul.f32 %v119_v8, %v116_v12  ;;  %v76_v12 = vld [vmem:[%s636_s1 + $0x8] sm:$0xff] }
  0xbe   :  { %v127_v16 = vadd.f32 %v125_v13, %v121_v14 }
  0xbf   :  { %v128_v17 = vadd.f32 %v125_v13, %v122_v15  ;;  %v566_v13 = vmov 11  }
  0xc0   :  { %v129_v18 = vmax.f32 %v127_v16, 0.0  ;;  %517 = vset.pattern.permute.xlu0 %v566_v13 }
  0xc1   :  { %v130_v19 = vmax.f32 %v128_v17, 0.0  ;;  %393 = vperm.xlu0 %517, %v591_v0  }
  0xc3   :  { %139 = vmatprep.subr.mxu0 %v130_v19 }
  0xc4   :  { %140 = vmatpush1.msra.mxu0 %v129_v18 }
  0xc5   :  { %489 = vmatmul.mubr.msk.f32.vlgmr.msra.gmra.mrb[0].mxu0 %vm135_vm0, %v75_v20 }
  0xc6   :  { %463 = vmatprep.mubr.f32.mxu0 %v559_v6 }
 0x103   :  { %v264_v14 = vpop.permute.xlu0 %263 }
 0x198   :  { %v205_v25 = vpop.f32.mrb[0].mxu0 }
 0x199   :  { %v206_v26 = vadd.f32 %v205_v25, %v133_v24  ;;  %v207_v27 = vpop.f32.mrb[1].mxu0 }
 0x19a   :  { %v208_v28 = vadd.f32 %v207_v27, %v133_v24 }
 0x19b   :  { %v210_v29 = vrot.slane %v206_v26, 4 }
 0x19c   :  { %v216_v30 = vrot.slane %v208_v28, 4 }
 0x19d   :  { %v211_v6 = vadd.f32 %v210_v29, %v206_v26 }
 0x19e   :  { %v217_v31 = vadd.f32 %v216_v30, %v208_v28 }
 0x19f   :  { %v212_v32 = vrot.slane %v211_v6, 2 }
 0x1a0   :  { %v218_v33 = vrot.slane %v217_v31, 2 }
 0x1a1   :  { %v213_v34 = vadd.f32 %v212_v32, %v211_v6 }
 0x1a2   :  { %v219_v35 = vadd.f32 %v218_v33, %v217_v31 }
 0x1a3   :  { %v214_v36 = vrot.slane %v213_v34, 1 }
 0x1a4   :  { %v220_v37 = vrot.slane %v219_v35, 1 }
 0x1a5   :  { %v215_v38 = vadd.f32 %v214_v36, %v213_v34 }
 0x1a6   :  { %v221_v39 = vadd.f32 %v220_v37, %v219_v35 }
 0x1a7   :  { %v222_v40 = vmul.f32 0.125, %v215_v38 }
 0x1a8   :  { %v223_v41 = vmul.f32 0.125, %v221_v39 }
 0x1a9   :  { %v224_v42 = vsub.f32 %v206_v26, %v222_v40 }
 0x1aa   :  { %v225_v43 = vsub.f32 %v208_v28, %v223_v41 }
 0x1ab   :  { %v226_v44 = vmul.f32 %v224_v42, %v224_v42 }
 0x1ac   :  { %v227_v45 = vmul.f32 %v225_v43, %v225_v43 }
 0x1ad   :  { %v228_v46 = vrot.slane %v226_v44, 4 }
 0x1ae   :  { %v234_v47 = vrot.slane %v227_v45, 4 }
 0x1af   :  { %v229_v48 = vadd.f32 %v228_v46, %v226_v44 }
 0x1b0   :  { %v235_v49 = vadd.f32 %v234_v47, %v227_v45 }
 0x1b1   :  { %v230_v50 = vrot.slane %v229_v48, 2 }
 0x1b2   :  { %v236_v51 = vrot.slane %v235_v49, 2 }
 0x1b3   :  { %v231_v52 = vadd.f32 %v230_v50, %v229_v48 }
 0x1b4   :  { %v237_v53 = vadd.f32 %v236_v51, %v235_v49  ;;  %v380_v51 = vpop.permute.xlu1 %379 }
 0x1b5   :  { %v232_v54 = vrot.slane %v231_v52, 1 }
 0x1b6   :  { %v238_v55 = vrot.slane %v237_v53, 1 }
 0x1b7   :  { %v233_v56 = vadd.f32 %v232_v54, %v231_v52 }
 0x1b8   :  { %v239_v57 = vadd.f32 %v238_v55, %v237_v53 }
 0x1b9   :  { %v240_v58 = vmul.f32 0.125, %v233_v56  ;;  %v386_v56 = vpop.permute.xlu1 %385 }
 0x1ba   :  { %v241_v59 = vmul.f32 0.125, %v239_v57 }
 0x1bb   :  { %v242_v60 = vadd.f32 1e-05, %v240_v58 }
 0x1bc   :  { %v243_v61 = vadd.f32 1e-05, %v241_v59 }
 0x1bd   :  { %522 = vrsqrt.f32 %v242_v60 }
 0x1be   :  { %524 = vrsqrt.f32 %v243_v61 }
 0x1c7   :  { %v523_v63 = vpop.eup %522 }
 0x1c8   :  { %v525_v1 = vpop.eup %524  ;;  %v246_v2 = vmul.f32 %v523_v63, %v224_v42  ;;  %v77_v63 = vld [vmem:[%s636_s1 + $0x10] sm:$0xff] }
 0x1c9   :  { %v247_v3 = vmul.f32 %v525_v1, %v225_v43  ;;  %v394_v1 = vpop.permute.xlu0 %393 }
 0x1ca   :  { %v252_v5 = vmul.f32 %v250_v62, %v246_v2 }
 0x1cb   :  { %v253_v7 = vmul.f32 %v250_v62, %v247_v3 }
 0x1cc   :  { %v258_v8 = vadd.f32 %v256_v4, %v252_v5 }
 0x1cd   :  { %v259_v9 = vadd.f32 %v256_v4, %v253_v7 }
 0x1ce   :  { %v260_v11 = vmax.f32 %v258_v8, 0.0 }
 0x1cf   :  { %v261_v10 = vmax.f32 %v259_v9, 0.0 }
 0x1d1   :  { %269 = vmatprep.subr.mxu1 %v261_v10 }
 0x1d2   :  { %270 = vmatpush1.msra.mxu1 %v260_v11 }
 0x1d3   :  { %490 = vmatmul.mubr.msk.f32.vlgmr.msra.gmra.mrb[0].mxu1 %vm135_vm0, %v76_v12 }
 0x2a6   :  { %v335_v15 = vpop.f32.mrb[0].mxu1 }
 0x2a7   :  { %v336_v16 = vadd.f32 %v335_v15, %v264_v14  ;;  %v337_v17 = vpop.f32.mrb[1].mxu1 }
 0x2a8   :  { %v338_v18 = vadd.f32 %v337_v17, %v264_v14 }
 0x2a9   :  { %v340_v19 = vrot.slane %v336_v16, 4 }
 0x2aa   :  { %v346_v20 = vrot.slane %v338_v18, 4 }
 0x2ab   :  { %v341_v21 = vadd.f32 %v340_v19, %v336_v16 }
 0x2ac   :  { %v347_v22 = vadd.f32 %v346_v20, %v338_v18 }
 0x2ad   :  { %v342_v23 = vrot.slane %v341_v21, 2 }
 0x2ae   :  { %v348_v24 = vrot.slane %v347_v22, 2 }
 0x2af   :  { %v343_v25 = vadd.f32 %v342_v23, %v341_v21 }
 0x2b0   :  { %v349_v26 = vadd.f32 %v348_v24, %v347_v22 }
 0x2b1   :  { %v344_v27 = vrot.slane %v343_v25, 1 }
 0x2b2   :  { %v350_v28 = vrot.slane %v349_v26, 1 }
 0x2b3   :  { %v345_v29 = vadd.f32 %v344_v27, %v343_v25 }
 0x2b4   :  { %v351_v30 = vadd.f32 %v350_v28, %v349_v26 }
 0x2b5   :  { %v352_v6 = vmul.f32 0.125, %v345_v29 }
 0x2b6   :  { %v353_v31 = vmul.f32 0.125, %v351_v30 }
 0x2b7   :  { %v354_v0 = vsub.f32 %v336_v16, %v352_v6 }
 0x2b8   :  { %v355_v32 = vsub.f32 %v338_v18, %v353_v31 }
 0x2b9   :  { %v356_v33 = vmul.f32 %v354_v0, %v354_v0 }
 0x2ba   :  { %v357_v34 = vmul.f32 %v355_v32, %v355_v32 }
 0x2bb   :  { %v358_v35 = vrot.slane %v356_v33, 4 }
 0x2bc   :  { %v364_v36 = vrot.slane %v357_v34, 4 }
 0x2bd   :  { %v359_v37 = vadd.f32 %v358_v35, %v356_v33 }
 0x2be   :  { %v365_v38 = vadd.f32 %v364_v36, %v357_v34 }
 0x2bf   :  { %v360_v39 = vrot.slane %v359_v37, 2 }
 0x2c0   :  { %v366_v40 = vrot.slane %v365_v38, 2 }
 0x2c1   :  { %v361_v41 = vadd.f32 %v360_v39, %v359_v37 }
 0x2c2   :  { %v367_v42 = vadd.f32 %v366_v40, %v365_v38 }
 0x2c3   :  { %v362_v43 = vrot.slane %v361_v41, 1 }
 0x2c4   :  { %v368_v44 = vrot.slane %v367_v42, 1 }
 0x2c5   :  { %v363_v45 = vadd.f32 %v362_v43, %v361_v41 }
 0x2c6   :  { %v369_v46 = vadd.f32 %v368_v44, %v367_v42 }
 0x2c7   :  { %v370_v47 = vmul.f32 0.125, %v363_v45 }
 0x2c8   :  { %v371_v48 = vmul.f32 0.125, %v369_v46 }
 0x2c9   :  { %v372_v49 = vadd.f32 1e-05, %v370_v47 }
 0x2ca   :  { %v373_v50 = vadd.f32 1e-05, %v371_v48 }
 0x2cb   :  { %526 = vrsqrt.f32 %v372_v49 }
 0x2cc   :  { %528 = vrsqrt.f32 %v373_v50 }
 0x2d5   :  { %v527_v52 = vpop.eup %526 }
 0x2d6   :  { %v529_v53 = vpop.eup %528  ;;  %v376_v54 = vmul.f32 %v527_v52, %v354_v0 }
 0x2d7   :  { %v377_v55 = vmul.f32 %v529_v53, %v355_v32 }
 0x2d8   :  { %v382_v57 = vmul.f32 %v380_v51, %v376_v54 }
 0x2d9   :  { %v383_v58 = vmul.f32 %v380_v51, %v377_v55 }
 0x2da   :  { %v388_v59 = vadd.f32 %v386_v56, %v382_v57 }
 0x2db   :  { %v389_v60 = vadd.f32 %v386_v56, %v383_v58 }
 0x2dc   :  { %v390_v62 = vmax.f32 %v388_v59, 0.0 }
 0x2dd   :  { %v391_v61 = vmax.f32 %v389_v60, 0.0 }
 0x2df   :  { %399 = vmatprep.subr.mxu0 %v391_v61 }
 0x2e0   :  { %400 = vmatpush1.msra.mxu0 %v390_v62 }
 0x2e1   :  { %491 = vmatmul.mubr.msk.f32.vlgmr.msra.gmra.mrb[2].mxu0 %vm135_vm0, %v77_v63 }
 0x3b4   :  { %v465_v2 = vpop.f32.mrb[2].mxu0 }
 0x3b5   :  { %v466_v3 = vadd.f32 %v465_v2, %v394_v1  ;;  %v467_v4 = vpop.f32.mrb[3].mxu0 }
 0x3b6   :  { %v468_v5 = vadd.f32 %v467_v4, %v394_v1 }
 0x3b8   :  { %v472_v7 = vcombine.low %v466_v3, %v468_v5 }
 0x3ba   :  { %474 = vst [vmem:[#allocation2] sm:$0xff] %v472_v7 }
 0x3bb   :  { %541 = shalt.err (!%p538_p4)
}
 0x3bc   :  { %s542_s24 = scalar_lea.hbm %s638_s3, 128 }
 0x3bd   :  { %p543_p5 = scmp.ne.s32.totalorder %s638_s3, %s542_s24  ;;  %p546_p6 = scmp.lt.u32.totalorder %s542_s24, %s638_s3 }
 0x3bf   :  { %p548_p7 = pnand %p546_p6, %p543_p5 }
 0x3c1   :  { %551 = shalt.err (!%p548_p7)
}
 0x3c2   :  { %484 = dma.vmem_to_hbm [thread:$0]  %s482_s21, 128, %s638_s3, [#allocation3]  }
 0x3c3   :  { %552 = dma.done.wait [#allocation3], 128  }
 0x3c4   :  { %553 = vsyncadd [#allocation3], 4294967168 }
 0x3c5   :  { %488 = vsyncpa [#allocation3], 1 }

</bundles_post_ra>
